<compile_context>
chip_gen: v7x
topology: tpu7x:2x2x1
jax: 0.10.0
libtpu: 0.0.40
codegen_flags: <defaults>
</compile_context>

<pallas_src>
import functools

import jax
import jax.numpy as jnp
from jax.experimental import pallas as pl
from jax.experimental.pallas import tpu as pltpu


# ---------------------------------------------------------------------------
# Fused per-tile kernel: interpolate + center + velocity MLP (both antithetic
# branches) + velocity-matching loss partial sum.  All tensors are transposed:
# atoms on lanes, coords/hidden on sublanes.
# ---------------------------------------------------------------------------
def _velocity_loss_kernel(t_ref, x0_ref, x1_ref, z_ref, mb_ref, mg_ref,
                          w1x_ref, w1t_ref, b1_ref, w2_ref, b2_ref,
                          out_ref, *, n_true):
    d, nt = x0_ref.shape
    tile = pl.program_id(0)

    t = t_ref[...]                                   # (1, Nt)
    x0 = x0_ref[...]                                 # (D, Nt)
    x1 = x1_ref[...]                                 # (D, Nt)
    z = z_ref[...]                                   # (D, Nt)

    # ---- antithetic interpolation + global centering (precomputed means) ----
    base = (1.0 - t) * x0 + t * x1                   # I(t)
    gz = (t * (1.0 - t)) * z                         # gamma(t) * z
    cb = base - mb_ref[...]                          # centered base
    cgz = gz - mg_ref[...]                           # centered gamma*z
    # xtp = cb + cgz ; xtm = cb - cgz (never materialized)

    # ---- layer 1: h = tanh(W1x^T x + W1t^T t + b1^T), rank-1 VPU FMAs -------
    w1x = w1x_ref[...]                               # (H, D)
    pre_c = b1_ref[...] + w1t_ref[...] * t           # shared bias + time (H, Nt)
    pre_c = pre_c + w1x[:, 0:1] * cb[0:1, :]
    pre_d = w1x[:, 0:1] * cgz[0:1, :]                # antithetic delta   (H, Nt)
    for k in range(1, d):                            # static unroll (D = 3)
        col = w1x[:, k:k + 1]                        # (H, 1)
        pre_c = pre_c + col * cb[k:k + 1, :]
        pre_d = pre_d + col * cgz[k:k + 1, :]
    hp = jnp.tanh(pre_c + pre_d)                     # (H, Nt)  plus branch
    hm = jnp.tanh(pre_c - pre_d)                     # (H, Nt)  minus branch

    # ---- layer 2: no concat/slice; bias cancels in the difference -----------
    hs = hp + hm
    hd = hp - hm
    w2 = w2_ref[...]                                 # (D, H)
    bsum = jnp.dot(w2, hs, preferred_element_type=jnp.float32) + 2.0 * b2_ref[...]
    bdiff = jnp.dot(w2, hd, preferred_element_type=jnp.float32)     # (D, Nt)

    # ---- antithetic velocity-matching loss, per-tile partial sum ------------
    dt_interp = x1 - x0                              # d/dt [(1-t)x0 + t x1]
    gdz = (1.0 - 2.0 * t) * z                        # gamma_dot(t) * z
    # 0.5(|b+|^2 + |b-|^2) == 0.25(|bsum|^2 + |bdiff|^2)
    elem = (0.25 * (bsum * bsum + bdiff * bdiff)
            - dt_interp * bsum
            - gdz * bdiff)                           # (D, Nt)

    # mask lanes past the true atom count (zero padding of the last tile)
    lane = jax.lax.broadcasted_iota(jnp.int32, (1, nt), 1)
    valid = (tile * nt + lane) < n_true
    partial = jnp.sum(jnp.where(valid, elem, 0.0))

    # lane-dense (1,128) output block: partial in lane 0, zeros elsewhere
    out_lane = jax.lax.broadcasted_iota(jnp.int32, (1, 128), 1)
    out_ref[...] = jnp.where(out_lane == 0, partial, 0.0)


def _round_up(x, m):
    return (x + m - 1) // m * m


def base_velocity_loss_forward(x0, x1, z, t, params, *, tile_atoms=2048):
    """Fused forward pass.  x0/x1/z: (N, D); t: (N, 1).  Returns scalar loss."""
    w1x, w1t, b1, w2, b2 = params
    n, d = x0.shape
    h = w1x.shape[1]

    # ---- one-time layout transpose: atoms -> 128-lane axis ------------------
    x0t, x1t, zt = x0.T, x1.T, z.T                   # (D, N)
    tt = t.T                                         # (1, N)
    w1xT = w1x.T                                     # (H, D)
    w1tT = w1t.T                                     # (H, 1)
    b1T = b1.T                                       # (H, 1)
    w2T = w2.T                                       # (D, H)
    b2T = b2.T                                       # (D, 1)

    # ---- global dim-0 means (centering is a global reduction; cheap XLA) ----
    base = (1.0 - tt) * x0t + tt * x1t
    gz = (tt * (1.0 - tt)) * zt
    mean_base = jnp.mean(base, axis=1, keepdims=True)   # (D, 1)
    mean_gz = jnp.mean(gz, axis=1, keepdims=True)       # (D, 1)

    # ---- atom tiling + zero padding to a lane-aligned tile multiple ---------
    nt = min(int(tile_atoms), _round_up(n, 128))
    nt = _round_up(nt, 128)
    n_pad = _round_up(n, nt)
    num_tiles = n_pad // nt
    pad = n_pad - n
    if pad:
        x0t = jnp.pad(x0t, ((0, 0), (0, pad)))
        x1t = jnp.pad(x1t, ((0, 0), (0, pad)))
        zt = jnp.pad(zt, ((0, 0), (0, pad)))
        tt = jnp.pad(tt, ((0, 0), (0, pad)))

    node_spec = pl.BlockSpec((d, nt), lambda i: (0, i))
    time_spec = pl.BlockSpec((1, nt), lambda i: (0, i))

    def full(shape):
        return pl.BlockSpec(shape, lambda i: (0, 0))

    partials = pl.pallas_call(
        functools.partial(_velocity_loss_kernel, n_true=n),
        out_shape=jax.ShapeDtypeStruct((1, 128 * num_tiles), jnp.float32),
        grid=(num_tiles,),
        in_specs=[
            time_spec,            # t        (1, Nt)
            node_spec,            # x0       (D, Nt)
            node_spec,            # x1       (D, Nt)
            node_spec,            # z        (D, Nt)
            full((d, 1)),         # mean_base
            full((d, 1)),         # mean_gz
            full((h, d)),         # W1x^T
            full((h, 1)),         # W1t^T
            full((h, 1)),         # b1^T
            full((d, h)),         # W2^T
            full((d, 1)),         # b2^T
        ],
        out_specs=pl.BlockSpec((1, 128), lambda i: (0, i)),
        compiler_params=pltpu.CompilerParams(
            dimension_semantics=("parallel",),
            vmem_limit_bytes=48 * 1024 * 1024,
        ),
    )(tt, x0t, x1t, zt, mean_base, mean_gz, w1xT, w1tT, b1T, w2T, b2T)

    # per-tile partial sums -> scalar loss (mean over atoms)
    return jnp.sum(partials) / n


# ---------------------------------------------------------------------------
# Pure-JAX reference (for an in-script correctness check)
# ---------------------------------------------------------------------------
def _reference_loss(x0, x1, z, t, params):
    w1x, w1t, b1, w2, b2 = params
    base = (1.0 - t) * x0 + t * x1
    gamma = t * (1.0 - t)
    xtp = base + gamma * z
    xtm = base - gamma * z
    xtp = xtp - jnp.mean(xtp, axis=0, keepdims=True)
    xtm = xtm - jnp.mean(xtm, axis=0, keepdims=True)

    def net(x):
        return jnp.tanh(x @ w1x + t * w1t + b1) @ w2 + b2

    bp = net(xtp)
    bm = net(xtm)
    dt_interp = x1 - x0
    gdot = 1.0 - 2.0 * t
    per_sample = (0.5 * jnp.sum(bp * bp, axis=1)
                  + 0.5 * jnp.sum(bm * bm, axis=1)
                  - jnp.sum(dt_interp * (bp + bm), axis=1)
                  - jnp.sum(gdot * z * (bp - bm), axis=1))
    return jnp.mean(per_sample)


if __name__ == "__main__":
    # Small synthetic "batch": 2 molecules x 8 atoms each, 3-D coordinates.
    num_graphs = 2
    atoms_per_graph = 8
    N = num_graphs * atoms_per_graph
    D = 3
    H = 32

    key = jax.random.PRNGKey(0)
    k_x0, k_x1, k_z, k_t, k_w1, k_w2 = jax.random.split(key, 6)

    x0 = jax.random.normal(k_x0, (N, D), dtype=jnp.float32)
    x1 = jax.random.normal(k_x1, (N, D), dtype=jnp.float32)
    z = jax.random.normal(k_z, (N, D), dtype=jnp.float32)

    # t_distr == 'uniform': one uniform time per graph, repeated per atom, unsqueezed.
    t_graph = jax.random.uniform(k_t, (num_graphs,), dtype=jnp.float32)
    t = jnp.repeat(t_graph, atoms_per_graph)[:, None]        # (N, 1)

    # Deterministic velocity-network parameters (W1 pre-split into coord / time parts).
    w1 = 0.1 * jax.random.normal(k_w1, (D + 1, H), dtype=jnp.float32)
    w1x = w1[:D, :]                                           # (D, H)
    w1t = w1[D:D + 1, :]                                      # (1, H)
    b1 = jnp.zeros((1, H), dtype=jnp.float32)
    w2 = 0.1 * jax.random.normal(k_w2, (H, D), dtype=jnp.float32)
    b2 = jnp.zeros((1, D), dtype=jnp.float32)
    mlp_params = (w1x, w1t, b1, w2, b2)

    fwd = jax.jit(base_velocity_loss_forward)
    loss = fwd(x0, x1, z, t, mlp_params)
    jax.block_until_ready(loss)

    ref = _reference_loss(x0, x1, z, t, mlp_params)
    assert loss.shape == () and jnp.isfinite(loss)
    assert jnp.allclose(loss, ref, rtol=1e-4, atol=1e-5), (loss, ref)
    print("KERNEL_OK")
</pallas_src>

<mosaic_0001>
module attributes {stable_mosaic.version = 11 : i64} {
  func.func @_velocity_loss_kernel(%arg0: i32, %arg1: memref<1x128xf32, #tpu.memory_space<vmem>>, %arg2: memref<3x128xf32, #tpu.memory_space<vmem>>, %arg3: memref<3x128xf32, #tpu.memory_space<vmem>>, %arg4: memref<3x128xf32, #tpu.memory_space<vmem>>, %arg5: memref<3x1xf32, #tpu.memory_space<vmem>>, %arg6: memref<3x1xf32, #tpu.memory_space<vmem>>, %arg7: memref<32x3xf32, #tpu.memory_space<vmem>>, %arg8: memref<32x1xf32, #tpu.memory_space<vmem>>, %arg9: memref<32x1xf32, #tpu.memory_space<vmem>>, %arg10: memref<3x32xf32, #tpu.memory_space<vmem>>, %arg11: memref<3x1xf32, #tpu.memory_space<vmem>>, %arg12: memref<1x128xf32, #tpu.memory_space<vmem>>) attributes {dimension_semantics = [#tpu.dimension_semantics<parallel>], iteration_bounds = array<i64: 1>, scalar_prefetch = 0 : i64, scratch_operands = 0 : i64, tpu.core_type = #tpu.core_type<tc>, window_params = [{transform_indices = @transform_0, window_bounds = array<i64: 1, 128>}, {transform_indices = @transform_1, window_bounds = array<i64: 3, 128>}, {transform_indices = @transform_2, window_bounds = array<i64: 3, 128>}, {transform_indices = @transform_3, window_bounds = array<i64: 3, 128>}, {pipeline_mode = #tpu.pipeline_mode<synchronous>, transform_indices = @transform_4, window_bounds = array<i64: 3, 1>}, {pipeline_mode = #tpu.pipeline_mode<synchronous>, transform_indices = @transform_5, window_bounds = array<i64: 3, 1>}, {pipeline_mode = #tpu.pipeline_mode<synchronous>, transform_indices = @transform_6, window_bounds = array<i64: 32, 3>}, {pipeline_mode = #tpu.pipeline_mode<synchronous>, transform_indices = @transform_7, window_bounds = array<i64: 32, 1>}, {pipeline_mode = #tpu.pipeline_mode<synchronous>, transform_indices = @transform_8, window_bounds = array<i64: 32, 1>}, {pipeline_mode = #tpu.pipeline_mode<synchronous>, transform_indices = @transform_9, window_bounds = array<i64: 3, 32>}, {pipeline_mode = #tpu.pipeline_mode<synchronous>, transform_indices = @transform_10, window_bounds = array<i64: 3, 1>}, {transform_indices = @transform_11, window_bounds = array<i64: 1, 128>}]} {
    %c0 = arith.constant 0 : index
    %c0_0 = arith.constant 0 : index
    %0 = vector.load %arg1[%c0, %c0_0] : memref<1x128xf32, #tpu.memory_space<vmem>>, vector<1x128xf32>
    %c0_1 = arith.constant 0 : index
    %c0_2 = arith.constant 0 : index
    %1 = vector.load %arg2[%c0_1, %c0_2] : memref<3x128xf32, #tpu.memory_space<vmem>>, vector<3x128xf32>
    %c0_3 = arith.constant 0 : index
    %c0_4 = arith.constant 0 : index
    %2 = vector.load %arg3[%c0_3, %c0_4] : memref<3x128xf32, #tpu.memory_space<vmem>>, vector<3x128xf32>
    %c0_5 = arith.constant 0 : index
    %c0_6 = arith.constant 0 : index
    %3 = vector.load %arg4[%c0_5, %c0_6] : memref<3x128xf32, #tpu.memory_space<vmem>>, vector<3x128xf32>
    %cst = arith.constant 1.000000e+00 : f32
    %4 = vector.broadcast %cst : f32 to vector<1x128xf32>
    %5 = arith.subf %4, %0 : vector<1x128xf32>
    %6 = vector.broadcast %5 : vector<1x128xf32> to vector<3x128xf32>
    %7 = arith.mulf %6, %1 : vector<3x128xf32>
    %8 = vector.broadcast %0 : vector<1x128xf32> to vector<3x128xf32>
    %9 = arith.mulf %8, %2 : vector<3x128xf32>
    %10 = arith.addf %7, %9 : vector<3x128xf32>
    %cst_7 = arith.constant 1.000000e+00 : f32
    %11 = vector.broadcast %cst_7 : f32 to vector<1x128xf32>
    %12 = arith.subf %11, %0 : vector<1x128xf32>
    %13 = arith.mulf %0, %12 : vector<1x128xf32>
    %14 = vector.broadcast %13 : vector<1x128xf32> to vector<3x128xf32>
    %15 = arith.mulf %14, %3 : vector<3x128xf32>
    %c0_8 = arith.constant 0 : index
    %c0_9 = arith.constant 0 : index
    %16 = vector.load %arg5[%c0_8, %c0_9] : memref<3x1xf32, #tpu.memory_space<vmem>>, vector<3x1xf32>
    %17 = vector.broadcast %16 : vector<3x1xf32> to vector<3x128xf32>
    %18 = arith.subf %10, %17 : vector<3x128xf32>
    %c0_10 = arith.constant 0 : index
    %c0_11 = arith.constant 0 : index
    %19 = vector.load %arg6[%c0_10, %c0_11] : memref<3x1xf32, #tpu.memory_space<vmem>>, vector<3x1xf32>
    %20 = vector.broadcast %19 : vector<3x1xf32> to vector<3x128xf32>
    %21 = arith.subf %15, %20 : vector<3x128xf32>
    %c0_12 = arith.constant 0 : index
    %c0_13 = arith.constant 0 : index
    %22 = vector.load %arg7[%c0_12, %c0_13] : memref<32x3xf32, #tpu.memory_space<vmem>>, vector<32x3xf32>
    %c0_14 = arith.constant 0 : index
    %c0_15 = arith.constant 0 : index
    %23 = vector.load %arg9[%c0_14, %c0_15] : memref<32x1xf32, #tpu.memory_space<vmem>>, vector<32x1xf32>
    %c0_16 = arith.constant 0 : index
    %c0_17 = arith.constant 0 : index
    %24 = vector.load %arg8[%c0_16, %c0_17] : memref<32x1xf32, #tpu.memory_space<vmem>>, vector<32x1xf32>
    %25 = vector.broadcast %24 : vector<32x1xf32> to vector<32x128xf32>
    %26 = vector.broadcast %0 : vector<1x128xf32> to vector<32x128xf32>
    %27 = arith.mulf %25, %26 : vector<32x128xf32>
    %28 = vector.broadcast %23 : vector<32x1xf32> to vector<32x128xf32>
    %29 = arith.addf %28, %27 : vector<32x128xf32>
    %30 = vector.extract_strided_slice %22 {offsets = [0, 0], sizes = [32, 1], strides = [1, 1]} : vector<32x3xf32> to vector<32x1xf32>
    %31 = vector.extract_strided_slice %18 {offsets = [0, 0], sizes = [1, 128], strides = [1, 1]} : vector<3x128xf32> to vector<1x128xf32>
    %32 = vector.broadcast %30 : vector<32x1xf32> to vector<32x128xf32>
    %33 = vector.broadcast %31 : vector<1x128xf32> to vector<32x128xf32>
    %34 = arith.mulf %32, %33 : vector<32x128xf32>
    %35 = arith.addf %29, %34 : vector<32x128xf32>
    %36 = vector.extract_strided_slice %22 {offsets = [0, 0], sizes = [32, 1], strides = [1, 1]} : vector<32x3xf32> to vector<32x1xf32>
    %37 = vector.extract_strided_slice %21 {offsets = [0, 0], sizes = [1, 128], strides = [1, 1]} : vector<3x128xf32> to vector<1x128xf32>
    %38 = vector.broadcast %36 : vector<32x1xf32> to vector<32x128xf32>
    %39 = vector.broadcast %37 : vector<1x128xf32> to vector<32x128xf32>
    %40 = arith.mulf %38, %39 : vector<32x128xf32>
    %41 = vector.extract_strided_slice %22 {offsets = [0, 1], sizes = [32, 1], strides = [1, 1]} : vector<32x3xf32> to vector<32x1xf32>
    %42 = vector.extract_strided_slice %18 {offsets = [1, 0], sizes = [1, 128], strides = [1, 1]} : vector<3x128xf32> to vector<1x128xf32>
    %43 = vector.broadcast %41 : vector<32x1xf32> to vector<32x128xf32>
    %44 = vector.broadcast %42 : vector<1x128xf32> to vector<32x128xf32>
    %45 = arith.mulf %43, %44 : vector<32x128xf32>
    %46 = arith.addf %35, %45 : vector<32x128xf32>
    %47 = vector.extract_strided_slice %21 {offsets = [1, 0], sizes = [1, 128], strides = [1, 1]} : vector<3x128xf32> to vector<1x128xf32>
    %48 = vector.broadcast %41 : vector<32x1xf32> to vector<32x128xf32>
    %49 = vector.broadcast %47 : vector<1x128xf32> to vector<32x128xf32>
    %50 = arith.mulf %48, %49 : vector<32x128xf32>
    %51 = arith.addf %40, %50 : vector<32x128xf32>
    %52 = vector.extract_strided_slice %22 {offsets = [0, 2], sizes = [32, 1], strides = [1, 1]} : vector<32x3xf32> to vector<32x1xf32>
    %53 = vector.extract_strided_slice %18 {offsets = [2, 0], sizes = [1, 128], strides = [1, 1]} : vector<3x128xf32> to vector<1x128xf32>
    %54 = vector.broadcast %52 : vector<32x1xf32> to vector<32x128xf32>
    %55 = vector.broadcast %53 : vector<1x128xf32> to vector<32x128xf32>
    %56 = arith.mulf %54, %55 : vector<32x128xf32>
    %57 = arith.addf %46, %56 : vector<32x128xf32>
    %58 = vector.extract_strided_slice %21 {offsets = [2, 0], sizes = [1, 128], strides = [1, 1]} : vector<3x128xf32> to vector<1x128xf32>
    %59 = vector.broadcast %52 : vector<32x1xf32> to vector<32x128xf32>
    %60 = vector.broadcast %58 : vector<1x128xf32> to vector<32x128xf32>
    %61 = arith.mulf %59, %60 : vector<32x128xf32>
    %62 = arith.addf %51, %61 : vector<32x128xf32>
    %63 = arith.addf %57, %62 : vector<32x128xf32>
    %64 = math.tanh %63 : vector<32x128xf32>
    %65 = arith.subf %57, %62 : vector<32x128xf32>
    %66 = math.tanh %65 : vector<32x128xf32>
    %67 = arith.addf %64, %66 : vector<32x128xf32>
    %68 = arith.subf %64, %66 : vector<32x128xf32>
    %c0_18 = arith.constant 0 : index
    %c0_19 = arith.constant 0 : index
    %69 = vector.load %arg10[%c0_18, %c0_19] : memref<3x32xf32, #tpu.memory_space<vmem>>, vector<3x32xf32>
    %cst_20 = arith.constant dense<0.000000e+00> : vector<3x128xf32>
    %70 = tpu.matmul %69, %67, %cst_20 {dimension_numbers = #tpu.dot_dimension_numbers<[1], [0], [0], [1], [0, 0, 1, 1], [], []>} : vector<3x32xf32>, vector<32x128xf32>, vector<3x128xf32> -> vector<3x128xf32>
    %c0_21 = arith.constant 0 : index
    %c0_22 = arith.constant 0 : index
    %71 = vector.load %arg11[%c0_21, %c0_22] : memref<3x1xf32, #tpu.memory_space<vmem>>, vector<3x1xf32>
    %cst_23 = arith.constant 2.000000e+00 : f32
    %72 = vector.broadcast %cst_23 : f32 to vector<3x1xf32>
    %73 = arith.mulf %72, %71 : vector<3x1xf32>
    %74 = vector.broadcast %73 : vector<3x1xf32> to vector<3x128xf32>
    %75 = arith.addf %70, %74 : vector<3x128xf32>
    %cst_24 = arith.constant dense<0.000000e+00> : vector<3x128xf32>
    %76 = tpu.matmul %69, %68, %cst_24 {dimension_numbers = #tpu.dot_dimension_numbers<[1], [0], [0], [1], [0, 0, 1, 1], [], []>} : vector<3x32xf32>, vector<32x128xf32>, vector<3x128xf32> -> vector<3x128xf32>
    %77 = arith.subf %2, %1 : vector<3x128xf32>
    %cst_25 = arith.constant 2.000000e+00 : f32
    %78 = vector.broadcast %cst_25 : f32 to vector<1x128xf32>
    %79 = arith.mulf %78, %0 : vector<1x128xf32>
    %cst_26 = arith.constant 1.000000e+00 : f32
    %80 = vector.broadcast %cst_26 : f32 to vector<1x128xf32>
    %81 = arith.subf %80, %79 : vector<1x128xf32>
    %82 = vector.broadcast %81 : vector<1x128xf32> to vector<3x128xf32>
    %83 = arith.mulf %82, %3 : vector<3x128xf32>
    %84 = arith.mulf %75, %75 : vector<3x128xf32>
    %85 = arith.mulf %76, %76 : vector<3x128xf32>
    %86 = arith.addf %84, %85 : vector<3x128xf32>
    %cst_27 = arith.constant 2.500000e-01 : f32
    %87 = vector.broadcast %cst_27 : f32 to vector<3x128xf32>
    %88 = arith.mulf %87, %86 : vector<3x128xf32>
    %89 = arith.mulf %77, %75 : vector<3x128xf32>
    %90 = arith.subf %88, %89 : vector<3x128xf32>
    %91 = arith.mulf %83, %76 : vector<3x128xf32>
    %92 = arith.subf %90, %91 : vector<3x128xf32>
    %93 = tpu.iota {dimensions = array<i32: 1>} : vector<1x128xi32>
    %c128_i32 = arith.constant 128 : i32
    %94 = arith.muli %arg0, %c128_i32 : i32
    %95 = vector.broadcast %94 : i32 to vector<1x128xi32>
    %96 = arith.addi %95, %93 : vector<1x128xi32>
    %c16_i32 = arith.constant 16 : i32
    %97 = vector.broadcast %c16_i32 : i32 to vector<1x128xi32>
    %98 = arith.cmpi slt, %96, %97 : vector<1x128xi32>
    %cst_28 = arith.constant 0.000000e+00 : f32
    %99 = vector.shape_cast %98 : vector<1x128xi1> to vector<1x128xi1>
    %100 = vector.broadcast %99 : vector<1x128xi1> to vector<3x128xi1>
    %101 = vector.broadcast %cst_28 : f32 to vector<3x128xf32>
    %102 = arith.select %100, %92, %101 : vector<3x128xi1>, vector<3x128xf32>
    %103 = vector.shape_cast %102 : vector<3x128xf32> to vector<1x3x128xf32>
    %cst_29 = arith.constant dense<0.000000e+00> : vector<1xf32>
    %104 = vector.multi_reduction <add>, %103, %cst_29 [1, 2] : vector<1x3x128xf32> to vector<1xf32>
    %105 = vector.shape_cast %104 : vector<1xf32> to vector<1x1x1xf32>
    %106 = vector.extract %105[0, 0, 0] : f32 from vector<1x1x1xf32>
    %107 = tpu.iota {dimensions = array<i32: 1>} : vector<1x128xi32>
    %c0_i32 = arith.constant 0 : i32
    %108 = vector.broadcast %c0_i32 : i32 to vector<1x128xi32>
    %109 = arith.cmpi eq, %107, %108 : vector<1x128xi32>
    %cst_30 = arith.constant 0.000000e+00 : f32
    %110 = vector.broadcast %106 : f32 to vector<1x128xf32>
    %111 = vector.broadcast %cst_30 : f32 to vector<1x128xf32>
    %112 = arith.select %109, %110, %111 : vector<1x128xi1>, vector<1x128xf32>
    %c0_31 = arith.constant 0 : index
    %c0_32 = arith.constant 0 : index
    %113 = vector.load %arg12[%c0_31, %c0_32] : memref<1x128xf32, #tpu.memory_space<vmem>>, vector<1x128xf32>
    tpu.vector_store %arg12[%c0_31, %c0_32], %112 {strides = array<i32>} : memref<1x128xf32, #tpu.memory_space<vmem>>, vector<1x128xf32>,
    return
  }
  func.func @transform_0(%arg0: i32) -> (i32, i32) {
    %c0_i32 = arith.constant 0 : i32
    %c0_i32_0 = arith.constant 0 : i32
    return %c0_i32, %arg0 : i32, i32
  }
  func.func @transform_1(%arg0: i32) -> (i32, i32) {
    %c0_i32 = arith.constant 0 : i32
    %c0_i32_0 = arith.constant 0 : i32
    return %c0_i32, %arg0 : i32, i32
  }
  func.func @transform_2(%arg0: i32) -> (i32, i32) {
    %c0_i32 = arith.constant 0 : i32
    %c0_i32_0 = arith.constant 0 : i32
    return %c0_i32, %arg0 : i32, i32
  }
  func.func @transform_3(%arg0: i32) -> (i32, i32) {
    %c0_i32 = arith.constant 0 : i32
    %c0_i32_0 = arith.constant 0 : i32
    return %c0_i32, %arg0 : i32, i32
  }
  func.func @transform_4(%arg0: i32) -> (i32, i32) {
    %c0_i32 = arith.constant 0 : i32
    %c0_i32_0 = arith.constant 0 : i32
    %c0_i32_1 = arith.constant 0 : i32
    return %c0_i32, %c0_i32_0 : i32, i32
  }
  func.func @transform_5(%arg0: i32) -> (i32, i32) {
    %c0_i32 = arith.constant 0 : i32
    %c0_i32_0 = arith.constant 0 : i32
    %c0_i32_1 = arith.constant 0 : i32
    return %c0_i32, %c0_i32_0 : i32, i32
  }
  func.func @transform_6(%arg0: i32) -> (i32, i32) {
    %c0_i32 = arith.constant 0 : i32
    %c0_i32_0 = arith.constant 0 : i32
    %c0_i32_1 = arith.constant 0 : i32
    return %c0_i32, %c0_i32_0 : i32, i32
  }
  func.func @transform_7(%arg0: i32) -> (i32, i32) {
    %c0_i32 = arith.constant 0 : i32
    %c0_i32_0 = arith.constant 0 : i32
    %c0_i32_1 = arith.constant 0 : i32
    return %c0_i32, %c0_i32_0 : i32, i32
  }
  func.func @transform_8(%arg0: i32) -> (i32, i32) {
    %c0_i32 = arith.constant 0 : i32
    %c0_i32_0 = arith.constant 0 : i32
    %c0_i32_1 = arith.constant 0 : i32
    return %c0_i32, %c0_i32_0 : i32, i32
  }
  func.func @transform_9(%arg0: i32) -> (i32, i32) {
    %c0_i32 = arith.constant 0 : i32
    %c0_i32_0 = arith.constant 0 : i32
    %c0_i32_1 = arith.constant 0 : i32
    return %c0_i32, %c0_i32_0 : i32, i32
  }
  func.func @transform_10(%arg0: i32) -> (i32, i32) {
    %c0_i32 = arith.constant 0 : i32
    %c0_i32_0 = arith.constant 0 : i32
    %c0_i32_1 = arith.constant 0 : i32
    return %c0_i32, %c0_i32_0 : i32, i32
  }
  func.func @transform_11(%arg0: i32) -> (i32, i32) {
    %c0_i32 = arith.constant 0 : i32
    %c0_i32_0 = arith.constant 0 : i32
    return %c0_i32, %arg0 : i32, i32
  }
}

</mosaic_0001>

<bundles_post_ra>
// kernel: base_velocity_loss_forward.1
= control target key start
LH: loop header
LB: loop body
LE: loop exit
PB: predicated region body
PF: predicated region fallthrough
CT: control target
= control target key end

     0   :  { %v562_v0 = vmov 0   ;;  %v563_v12 = vmov 1   ;;  %v564_v14 = vmov 2   ;;  %v565_v17 = vmov 0.0|0.0   ;;  %s742_s7 = inlined_call_operand.vmem [shape: f32[32,1], index: 7, kind: input, shape index: {}]   ;;  %s743_s4 = inlined_call_operand.vmem [shape: f32[3,1], index: 4, kind: input, shape index: {}]   ;;  %s744_s5 = inlined_call_operand.vmem [shape: f32[3,1], index: 5, kind: input, shape index: {}]   ;;  %s745_s8 = inlined_call_operand.vmem [shape: f32[32,1], index: 8, kind: input, shape index: {}]   ;;  %s746_s6 = inlined_call_operand.vmem [shape: f32[32,3], index: 6, kind: input, shape index: {}]   ;;  %s747_s10 = inlined_call_operand.vmem [shape: f32[3,1], index: 10, kind: input, shape index: {}]   ;;  %s748_s0 = inlined_call_operand.vmem [shape: f32[1,128], index: 0, kind: input, shape index: {}]   ;;  %s749_s1 = inlined_call_operand.vmem [shape: f32[3,128], index: 1, kind: input, shape index: {}]   ;;  %s750_s2 = inlined_call_operand.vmem [shape: f32[3,128], index: 2, kind: input, shape index: {}]   ;;  %s751_s3 = inlined_call_operand.vmem [shape: f32[3,128], index: 3, kind: input, shape index: {}]   ;;  %s752_s9 = inlined_call_operand.vmem [shape: f32[3,32], index: 9, kind: input, shape index: {}]   ;;  %s753_s11 = inlined_call_operand.vmem [shape: f32[1,128], index: 11, kind: output, shape index: {}]  }
   0x1   :  { %537 = vset.pattern.permute.xlu1 %v562_v0  ;;  %536 = vset.pattern.permute.xlu0 %v562_v0  ;;  %v88_v1 = vld [vmem:[%s742_s7] sm:$0xff]  ;;  %v89_v3 = vld [vmem:[%s742_s7 + $0x8] sm:$0xff]  ;;  %v91_v9 = vld [vmem:[%s742_s7 + $0x18] sm:$0xff]  ;;  %vm566_vm0 = vmmov 0   ;;  %v567_v18 = vmov 0.0   ;;  %v44_v21 = vlaneseq  ;;  %vm292_vm1 = vcmask 261120  }
   0x2   :  { %v66_v2 = vld [vmem:[%s743_s4] sm:$0x7]  ;;  %94 = vperm.xlu1 %537, %v88_v1   ;;  %v85_v5 = vld [vmem:[%s745_s8 + $0x8] sm:$0xff]  ;;  %v90_v10 = vld [vmem:[%s742_s7 + $0x10] sm:$0xff]  ;;  %516 = vmatprep.subr.bf16.mxu0 %v565_v17  ;;  %vm463_vm3 = vcmask 1042432  }
   0x3   :  { %69 = vperm.xlu0 %536, %v66_v2   ;;  %v73_v4 = vld [vmem:[%s744_s5] sm:$0x7]  ;;  %v81_v7 = vld [vmem:[%s746_s6 + $0x8] sm:$0xff]  ;;  %v87_v11 = vld [vmem:[%s745_s8 + $0x18] sm:$0xff]  ;;  %522 = vmatprep.subr.bf16.mxu1 %v565_v17  ;;  %v45_v24 = vshrl.u32 %v44_v21, 7 }
   0x4   :  { %v84_v6 = vld [vmem:[%s745_s8] sm:$0xff]  ;;  %v86_v13 = vld [vmem:[%s745_s8 + $0x10] sm:$0xff]  ;;  %v83_v16 = vld [vmem:[%s746_s6 + $0x18] sm:$0xff]  ;;  %502 = vmatprep.mubr.msk.f32.mxu0 %vm566_vm0, %v567_v18  ;;  %513 = vmatprep.mubr.msk.f32.mxu1 %vm566_vm0, %v567_v18 }
   0x5   :  { %v80_v8 = vld [vmem:[%s746_s6] sm:$0xff]  ;;  %v82_v15 = vld [vmem:[%s746_s6 + $0x10] sm:$0xff]  ;;  %v682_v29 = vsub.s32 0, %v45_v24  ;;  %v198_v51 = vsub.s32 1, %v45_v24  ;;  %v238_v54 = vsub.s32 2, %v45_v24 }
   0x6   :  { %99 = vperm.xlu1 %537, %v89_v3   ;;  %v285_v19 = vld [vmem:[%s747_s10] sm:$0x7] }
   0x7   :  { %76 = vperm.xlu0 %536, %v73_v4   ;;  %v286_v20 = vmul.f32 2.0, %v285_v19  ;;  %v679_v25 = vld [vmem:[%s748_s0] sm:$0x1] }
   0x8   :  { %v42_v26 = vsub.f32 1.0, %v679_v25  ;;  %v688_v31 = vld [vmem:[%s749_s1] sm:$0x7]  ;;  %v697_v35 = vrot.slane %v679_v25, %v682_v29 }
   0x9   :  { %v693_v32 = vld [vmem:[%s750_s2] sm:$0x7] }
   0xa   :  { %123 = vperm.xlu1 %537, %v85_v5   ;;  %v47_v30 = vrot.slane %v42_v26, %v682_v29  ;;  %v56_v37 = vmul.f32 %v697_v35, %v693_v32  ;;  %v58_v40 = vmul.f32 %v42_v26, %v679_v25  ;;  %v707_v45 = vld [vmem:[%s751_s3] sm:$0x7] }
   0xb   :  { %118 = vperm.xlu0 %536, %v84_v6  }
   0xc   :  { %v49_v36 = vmul.f32 %v47_v30, %v688_v31  ;;  %v63_v44 = vrot.slane %v58_v40, %v682_v29 }
   0xe   :  { %147 = vperm.xlu1 %537, %v81_v7   ;;  %v57_v41 = vadd.f32 %v56_v37, %v49_v36  ;;  %v65_v48 = vmul.f32 %v63_v44, %v707_v45 }
   0xf   :  { %142 = vperm.xlu0 %536, %v80_v8  }
  0x12   :  { %109 = vperm.xlu1 %537, %v91_v9  }
  0x13   :  { %104 = vperm.xlu0 %536, %v90_v10  }
  0x16   :  { %538 = vset.pattern.permute.xlu1 %v563_v12 }
  0x17   :  { %133 = vperm.xlu0 %536, %v87_v11   ;;  %185 = vperm.xlu1 %538, %v81_v7  }
  0x1b   :  { %540 = vset.pattern.permute.xlu0 %v564_v14  ;;  %539 = vset.pattern.permute.xlu1 %v562_v0 }
  0x1c   :  { %221 = vperm.xlu0 %540, %v80_v8   ;;  %128 = vperm.xlu1 %539, %v86_v13  }
  0x20   :  { %541 = vset.pattern.permute.xlu0 %v563_v12  ;;  %152 = vperm.xlu1 %539, %v82_v15  }
  0x21   :  { %181 = vperm.xlu0 %541, %v80_v8  }
  0x24   :  { %157 = vperm.xlu1 %539, %v83_v16  }
  0x25   :  { %193 = vperm.xlu0 %541, %v83_v16  }
  0x28   :  { %542 = vset.pattern.permute.xlu1 %v564_v14 }
  0x29   :  { %545 = vset.pattern.permute.xlu0 %v562_v0  ;;  %225 = vperm.xlu1 %542, %v81_v7  }
  0x2a   :  { %289 = vperm.xlu0 %545, %v286_v20  }
  0x2d   :  { %543 = vset.pattern.permute.xlu1 %v563_v12 }
  0x2e   :  { %189 = vperm.xlu1 %543, %v82_v15  }
  0x32   :  { %544 = vset.pattern.permute.xlu1 %v564_v14 }
  0x33   :  { %229 = vperm.xlu1 %544, %v82_v15  }
  0x37   :  { %233 = vperm.xlu1 %544, %v83_v16  }
  0x81   :  { %v95_v22 = vpop.permute.xlu1 %94 }
  0x82   :  { %v70_v23 = vpop.permute.xlu0 %69  ;;  %v112_v56 = vmul.f32 %v95_v22, %v697_v35 }
  0x83   :  { %v72_v46 = vsub.f32 %v57_v41, %v70_v23 }
  0x85   :  { %v100_v27 = vpop.permute.xlu1 %99  ;;  %v163_v50 = vrot.slane %v72_v46, %v682_v29  ;;  %v199_v58 = vrot.slane %v72_v46, %v198_v51  ;;  %v713_v62 = vrot.slane %v72_v46, %v238_v54 }
  0x86   :  { %v77_v28 = vpop.permute.xlu0 %76  ;;  %v113_v6 = vmul.f32 %v100_v27, %v697_v35 }
  0x87   :  { %v79_v52 = vsub.f32 %v65_v48, %v77_v28 }
  0x89   :  { %v124_v33 = vpop.permute.xlu1 %123  ;;  %v175_v59 = vrot.slane %v79_v52, %v682_v29  ;;  %v211_v60 = vrot.slane %v79_v52, %v198_v51  ;;  %v715_v63 = vrot.slane %v79_v52, %v238_v54 }
  0x8a   :  { %v119_v34 = vpop.permute.xlu0 %118  ;;  %v137_v13 = vadd.f32 %v124_v33, %v113_v6 }
  0x8b   :  { %v136_v61 = vadd.f32 %v119_v34, %v112_v56 }
  0x8d   :  { %v148_v38 = vpop.permute.xlu1 %147 }
  0x8e   :  { %v143_v39 = vpop.permute.xlu0 %142  ;;  %v165_v7 = vmul.f32 %v163_v50, %v148_v38  ;;  %v177_v20 = vmul.f32 %v175_v59, %v148_v38 }
  0x8f   :  { %v164_v57 = vmul.f32 %v163_v50, %v143_v39  ;;  %v176_v3 = vmul.f32 %v175_v59, %v143_v39 }
  0x90   :  { %v169_v19 = vadd.f32 %v165_v7, %v137_v13 }
  0x91   :  { %v110_v42 = vpop.permute.xlu1 %109  ;;  %v168_v2 = vadd.f32 %v164_v57, %v136_v61 }
  0x92   :  { %v105_v43 = vpop.permute.xlu0 %104  ;;  %v115_v38 = vmul.f32 %v110_v42, %v697_v35 }
  0x93   :  { %v114_v37 = vmul.f32 %v105_v43, %v697_v35 }
  0x96   :  { %v134_v47 = vpop.permute.xlu0 %133  ;;  %v186_v49 = vpop.permute.xlu1 %185 }
  0x97   :  { %v201_v14 = vmul.f32 %v199_v58, %v186_v49  ;;  %v213_v18 = vmul.f32 %v211_v60, %v186_v49  ;;  %v139_v52 = vadd.f32 %v134_v47, %v115_v38 }
  0x99   :  { %v205_v22 = vadd.f32 %v201_v14, %v169_v19  ;;  %v217_v26 = vadd.f32 %v213_v18, %v177_v20 }
  0x9b   :  { %v222_v53 = vpop.permute.xlu0 %221  ;;  %v129_v55 = vpop.permute.xlu1 %128 }
  0x9c   :  { %v240_v8 = vmul.f32 %v713_v62, %v222_v53  ;;  %v252_v9 = vmul.f32 %v715_v63, %v222_v53  ;;  %v138_v46 = vadd.f32 %v129_v55, %v114_v37 }
  0x9f   :  { %v153_v0 = vpop.permute.xlu1 %152 }
  0xa0   :  { %v182_v1 = vpop.permute.xlu0 %181  ;;  %v166_v33 = vmul.f32 %v163_v50, %v153_v0  ;;  %v178_v54 = vmul.f32 %v175_v59, %v153_v0 }
  0xa1   :  { %v200_v4 = vmul.f32 %v199_v58, %v182_v1  ;;  %v212_v5 = vmul.f32 %v211_v60, %v182_v1 }
  0xa2   :  { %v170_v53 = vadd.f32 %v166_v33, %v138_v46 }
  0xa3   :  { %v204_v10 = vadd.f32 %v200_v4, %v168_v2  ;;  %v216_v11 = vadd.f32 %v212_v5, %v176_v3  ;;  %v158_v12 = vpop.permute.xlu1 %157 }
  0xa4   :  { %v167_v44 = vmul.f32 %v163_v50, %v158_v12  ;;  %v194_v48 = vpop.permute.xlu0 %193  ;;  %v179_v43 = vmul.f32 %v175_v59, %v158_v12 }
  0xa5   :  { %v244_v15 = vadd.f32 %v240_v8, %v204_v10  ;;  %v256_v16 = vadd.f32 %v252_v9, %v216_v11  ;;  %v215_v57 = vmul.f32 %v211_v60, %v194_v48  ;;  %v203_v42 = vmul.f32 %v199_v58, %v194_v48 }
  0xa6   :  { %v171_v56 = vadd.f32 %v167_v44, %v139_v52 }
  0xa7   :  { %v260_v23 = vadd.f32 %v256_v16, %v244_v15  ;;  %v268_v27 = vsub.f32 %v244_v15, %v256_v16  ;;  %v219_v5 = vadd.f32 %v215_v57, %v179_v43 }
  0xa8   :  { %v226_v24 = vpop.permute.xlu1 %225  ;;  %v207_v7 = vadd.f32 %v203_v42, %v171_v56 }
  0xa9   :  { %v241_v28 = vmul.f32 %v713_v62, %v226_v24  ;;  %v253_v30 = vmul.f32 %v715_v63, %v226_v24  ;;  %546 = vtanh.f32 %v260_v23  ;;  %v290_v33 = vpop.permute.xlu0 %289 }
  0xaa   :  { %548 = vtanh.f32 %v268_v27 }
  0xab   :  { %v245_v34 = vadd.f32 %v241_v28, %v205_v22  ;;  %v257_v36 = vadd.f32 %v253_v30, %v217_v26 }
  0xad   :  { %v261_v39 = vadd.f32 %v257_v36, %v245_v34  ;;  %v269_v40 = vsub.f32 %v245_v34, %v257_v36  ;;  %v190_v41 = vpop.permute.xlu1 %189  ;;  %v284_v36 = vld [vmem:[%s752_s9] sm:$0x7] }
  0xae   :  { %v202_v49 = vmul.f32 %v199_v58, %v190_v41  ;;  %v214_v51 = vmul.f32 %v211_v60, %v190_v41 }
  0xaf   :  { %550 = vtanh.f32 %v261_v39 }
  0xb0   :  { %552 = vtanh.f32 %v269_v40  ;;  %v206_v1 = vadd.f32 %v202_v49, %v170_v53  ;;  %v218_v2 = vadd.f32 %v214_v51, %v178_v54  ;;  %v436_v49 = vsub.f32 %v693_v32, %v688_v31 }
  0xb1   :  { %v455_v54 = vand.u32 127, %v44_v21 }
  0xb2   :  { %v230_v61 = vpop.permute.xlu1 %229 }
  0xb3   :  { %v242_v3 = vmul.f32 %v713_v62, %v230_v61  ;;  %v254_v35 = vmul.f32 %v715_v63, %v230_v61  ;;  %v547_v4 = vpop.eup %546  ;;  %vm459_vm2 = vcmp.lt.s32.totalorder %v455_v54, 16  ;;  %vm474_vm4 = vcmp.eq.s32.totalorder %v455_v54, 0 }
  0xb4   :  { %v549_v47 = vpop.eup %548 }
  0xb5   :  { %v246_v50 = vadd.f32 %v242_v3, %v206_v1  ;;  %v258_v55 = vadd.f32 %v254_v35, %v218_v2  ;;  %v276_v13 = vadd.f32 %v549_v47, %v547_v4  ;;  %v280_v58 = vsub.f32 %v547_v4, %v549_v47 }
  0xb6   :  { %v234_v6 = vpop.permute.xlu1 %233 }
  0xb7   :  { %v262_v8 = vadd.f32 %v258_v55, %v246_v50  ;;  %v243_v0 = vmul.f32 %v713_v62, %v234_v6  ;;  %v255_v59 = vmul.f32 %v715_v63, %v234_v6  ;;  %v270_v60 = vsub.f32 %v246_v50, %v258_v55 }
  0xb9   :  { %v551_v9 = vpop.eup %550  ;;  %v247_v10 = vadd.f32 %v243_v0, %v207_v7  ;;  %v259_v11 = vadd.f32 %v255_v59, %v219_v5  ;;  %554 = vtanh.f32 %v262_v8 }
  0xba   :  { %v553_v12 = vpop.eup %552  ;;  %556 = vtanh.f32 %v270_v60 }
  0xbb   :  { %v263_v14 = vadd.f32 %v259_v11, %v247_v10  ;;  %v271_v15 = vsub.f32 %v247_v10, %v259_v11  ;;  %v277_v16 = vadd.f32 %v553_v12, %v551_v9  ;;  %v281_v18 = vsub.f32 %v551_v9, %v553_v12 }
  0xbd   :  { %558 = vtanh.f32 %v263_v14  ;;  %v517_v19 = vpack.c.bf16 %v277_v16, %v276_v13  ;;  %v523_v20 = vpack.c.bf16 %v281_v18, %v280_v58 }
  0xbe   :  { %560 = vtanh.f32 %v271_v15 }
  0xbf   :  { %518 = vmatpush3.bf16.msra.mxu0 %v517_v19  ;;  %524 = vmatpush3.bf16.msra.mxu1 %v523_v20 }
  0xc0   :  { %519 = vmatprep.subr.bf16.mxu0 %v565_v17  ;;  %525 = vmatprep.subr.bf16.mxu1 %v565_v17  ;;  %v437_v17 = vmul.f32 2.0, %v679_v25 }
  0xc2   :  { %v438_v37 = vsub.f32 1.0, %v437_v17 }
  0xc3   :  { %v555_v62 = vpop.eup %554 }
  0xc4   :  { %v557_v63 = vpop.eup %556  ;;  %v443_v44 = vrot.slane %v438_v37, %v682_v29 }
  0xc5   :  { %v278_v24 = vadd.f32 %v557_v63, %v555_v62  ;;  %v282_v27 = vsub.f32 %v555_v62, %v557_v63 }
  0xc6   :  { %v445_v52 = vmul.f32 %v443_v44, %v707_v45 }
  0xc7   :  { %v559_v22 = vpop.eup %558 }
  0xc8   :  { %v561_v23 = vpop.eup %560 }
  0xc9   :  { %v279_v26 = vadd.f32 %v561_v23, %v559_v22  ;;  %v283_v28 = vsub.f32 %v559_v22, %v561_v23 }
  0xcb   :  { %v520_v30 = vpack.c.bf16 %v279_v26, %v278_v24  ;;  %v526_v34 = vpack.c.bf16 %v283_v28, %v282_v27 }
  0xcd   :  { %521 = vmatpush3.bf16.msra.mxu0 %v520_v30  ;;  %527 = vmatpush3.bf16.msra.mxu1 %v526_v34 }
  0xd0   :  { %503 = vmatmul.mubr.msk.f32.vlgmr.msra.gmra.mrb[0].mxu0 %vm292_vm1, %v284_v36  ;;  %514 = vmatmul.mubr.msk.f32.vlgmr.msra.gmra.mrb[0].mxu1 %vm292_vm1, %v284_v36 }
 0x1a3   :  { %v362_v39 = vpop.f32.mrb[0].mxu0  ;;  %v432_v40 = vpop.f32.mrb[0].mxu1 }
 0x1a4   :  { %v363_v41 = vadd.f32 %v362_v39, %v290_v33  ;;  %v504_v38 = vpop.f32.mrb[1].mxu0  ;;  %v447_v46 = vmul.f32 %v432_v40, %v432_v40  ;;  %v515_v48 = vpop.f32.mrb[1].mxu1  ;;  %v452_v43 = vmul.f32 %v445_v52, %v432_v40 }
 0x1a6   :  { %v446_v51 = vmul.f32 %v363_v41, %v363_v41  ;;  %v450_v25 = vmul.f32 %v436_v49, %v363_v41 }
 0x1a8   :  { %v448_v53 = vadd.f32 %v447_v46, %v446_v51 }
 0x1aa   :  { %v449_v56 = vmul.f32 0.25, %v448_v53 }
 0x1ac   :  { %v451_v57 = vsub.f32 %v449_v56, %v450_v25 }
 0x1ae   :  { %v453_v61 = vsub.f32 %v451_v57, %v452_v43 }
 0x1b0   :  { %v462_v1 = vsel %vm459_vm2, %v453_v61, 0.0 }
 0x1b1   :  { %v464_v29 = vsel %vm463_vm3, %v462_v1, 0.0 }
 0x1b2   :  { %465 = vadd.xlane.f32.xlu1 %v464_v29 }
 0x23f   :  { %v466_v2 = vpop.xlane.xlu1 %465 }
 0x240   :  { %v467_v3 = vrot.slane %v466_v2, 4 }
 0x242   :  { %v468_v35 = vadd.f32 %v467_v3, %v466_v2 }
 0x244   :  { %v469_v31 = vrot.slane %v468_v35, 2 }
 0x246   :  { %v470_v32 = vadd.f32 %v469_v31, %v468_v35 }
 0x248   :  { %v471_v42 = vrot.slane %v470_v32, 1 }
 0x24a   :  { %v472_v45 = vadd.f32 %v471_v42, %v470_v32 }
 0x24c   :  { %528 = vpush %v472_v45 }
 0x27d   :  { %s529_s9 = spop %528 }
 0x27e   :  { %v475_v21 = vstv %s529_s9 }
 0x27f   :  { %v476_v50 = vsel %vm474_vm4, %v475_v21, 0.0 }
 0x280   :  { %477 = vst [vmem:[%s753_s11] sm:$0x1] %v476_v50 }

</bundles_post_ra>
